<compile_context>
chip_gen: v7x
topology: tpu7x:2x2x1
jax: 0.10.0
libtpu: 0.0.40
codegen_flags: <defaults>
</compile_context>

<pallas_src>
import functools

import jax
import jax.numpy as jnp
from jax.experimental import pallas as pl
from jax.experimental.pallas import tpu as pltpu


def _vmem():
    return pl.BlockSpec(memory_space=pltpu.MemorySpace.VMEM)


# ------------------------------------------------------------------
# Fused decoder-step kernel
# PyTorch GRU equations (gate order r, z, n):
#   r = sigmoid(x@Wir^T + b_ir + h@Whr^T + b_hr)
#   z = sigmoid(x@Wiz^T + b_iz + h@Whz^T + b_hz)
#   n = tanh   (x@Win^T + b_in + r*(h@Whn^T + b_hn))
#   h' = (1-z)*n + z*h  ==  n + z*(h - n)
# With fused gates: gi = x@Wi (+ pre-summed/packed biases), gh = h@Wh.
# ------------------------------------------------------------------
def _decoder_step_kernel(ids_ref, emb_ref, hid_ref, *rest, n_layers, hid_size):
    gate_w = rest[:2 * n_layers]                       # wi_0, wh_0, wi_1, wh_1, ...
    bias_ref, w_out_ref, b_out_ref = rest[2 * n_layers:2 * n_layers + 3]
    pred_ref, hnew_ref = rest[2 * n_layers + 3:]
    H = hid_size

    # --- embedding lookup as one-hot matmul (MXU-friendly gather at small V) ---
    ids = ids_ref[...]                                 # [B_pad, 1] int32
    B_pad = ids.shape[0]
    V_emb = emb_ref.shape[0]
    iota = jax.lax.broadcasted_iota(jnp.int32, (B_pad, V_emb), 1)
    onehot = (iota == ids).astype(jnp.bfloat16)        # [B_pad, V] (exact 0/1)
    x = jnp.dot(onehot, emb_ref[...],
                preferred_element_type=jnp.float32)    # [B_pad, emb_dim] f32
    # dropout in eval mode (p effectively 0) == identity.
    # TODO(synk): training-mode dropout (p > 0) not implemented.

    # --- stacked single-step GRU (static Python loop over layers) --------------
    for l in range(n_layers):
        wi_ref, wh_ref = gate_w[2 * l], gate_w[2 * l + 1]
        bias = bias_ref[l]                             # [1, 4H] f32
        b_i = bias[:, :3 * H]                          # [r+hr | z+hz | in]
        b_hn = bias[:, 3 * H:]                         # [hn]
        h = hid_ref[l]                                 # [B_pad, H] f32

        gi = jnp.dot(x.astype(jnp.bfloat16), wi_ref[...],
                     preferred_element_type=jnp.float32) + b_i   # [B_pad, 3H]
        gh = jnp.dot(h.astype(jnp.bfloat16), wh_ref[...],
                     preferred_element_type=jnp.float32)         # [B_pad, 3H]

        rz = jax.nn.sigmoid(gi[:, :2 * H] + gh[:, :2 * H])       # [B_pad, 2H]
        r = rz[:, :H]
        z = rz[:, H:]
        n = jnp.tanh(gi[:, 2 * H:] + r * (gh[:, 2 * H:] + b_hn))
        h_new = n + z * (h - n)                        # == (1-z)*n + z*h
        hnew_ref[l] = h_new
        x = h_new                                      # feed next layer

    # --- fused embedding2vocab1/2/3 (one matmul) -------------------------------
    pred_ref[...] = (
        jnp.dot(x.astype(jnp.bfloat16), w_out_ref[...],
                preferred_element_type=jnp.float32) + b_out_ref[...])


# ------------------------------------------------------------------
# One-time parameter preparation (hoisted layout transforms)
# ------------------------------------------------------------------
def prepare_params(params):
    """PyTorch-layout params -> kernel-ready layout. Run once, not per step."""
    H = params["w_hh"][0].shape[1]
    n_layers = len(params["w_ih"])

    wi, wh, biases = [], [], []
    for l in range(n_layers):
        w_ih = jnp.asarray(params["w_ih"][l], jnp.float32)   # [3H, D_in]
        w_hh = jnp.asarray(params["w_hh"][l], jnp.float32)   # [3H, H]
        b_ih = jnp.asarray(params["b_ih"][l], jnp.float32)   # [3H]
        b_hh = jnp.asarray(params["b_hh"][l], jnp.float32)   # [3H]
        wi.append(w_ih.T.astype(jnp.bfloat16))               # [D_in, 3H] (r|z|n cols)
        wh.append(w_hh.T.astype(jnp.bfloat16))               # [H, 3H]
        biases.append(jnp.concatenate([
            b_ih[:H] + b_hh[:H],                             # r (pre-summed)
            b_ih[H:2 * H] + b_hh[H:2 * H],                   # z (pre-summed)
            b_ih[2 * H:],                                    # b_in
            b_hh[2 * H:],                                    # b_hn
        ]).reshape(1, 4 * H))
    bias_all = jnp.stack(biases, axis=0)                     # [L, 1, 4H] f32

    # Collapse the activation-free Linear chain H->2H->4H->V into one W, b.
    w1t = jnp.asarray(params["w1"], jnp.float32).T           # [H, 2H]
    w2t = jnp.asarray(params["w2"], jnp.float32).T           # [2H, 4H]
    w3t = jnp.asarray(params["w3"], jnp.float32).T           # [4H, V]
    b1 = jnp.asarray(params["b1"], jnp.float32)
    b2 = jnp.asarray(params["b2"], jnp.float32)
    b3 = jnp.asarray(params["b3"], jnp.float32)
    w_out = (w1t @ w2t @ w3t)                                # [H, V], computed in f32
    b_out = (b1 @ w2t @ w3t + b2 @ w3t + b3).reshape(1, -1)  # [1, V] f32

    return {
        "embedding": jnp.asarray(params["embedding"], jnp.float32).astype(jnp.bfloat16),
        "wi": wi,
        "wh": wh,
        "bias": bias_all,
        "w_out": w_out.astype(jnp.bfloat16),
        "b_out": b_out,
    }


# ------------------------------------------------------------------
# One decode step on PADDED state (use this inside an autoregressive loop).
# hid_pad is aliased to the new-hidden output -> updated in place.
# ------------------------------------------------------------------
def decoder_step(prepped, ids_pad, hid_pad):
    n_layers, B_pad, H = hid_pad.shape
    V = prepped["w_out"].shape[1]

    flat = [ids_pad, prepped["embedding"], hid_pad]
    for l in range(n_layers):
        flat.append(prepped["wi"][l])
        flat.append(prepped["wh"][l])
    flat.extend([prepped["bias"], prepped["w_out"], prepped["b_out"]])

    kernel = functools.partial(_decoder_step_kernel,
                               n_layers=n_layers, hid_size=H)
    return pl.pallas_call(
        kernel,
        out_shape=(jax.ShapeDtypeStruct((B_pad, V), jnp.float32),
                   jax.ShapeDtypeStruct((n_layers, B_pad, H), jnp.float32)),
        in_specs=[_vmem()] * len(flat),
        out_specs=(_vmem(), _vmem()),
        input_output_aliases={2: 1},   # hidden in -> new hidden out (in place)
        # TODO(synk): at realistic vocab sizes, tile the vocab projection with a
        # "parallel" grid axis over V (BlockSpec((H, TILE_V), lambda j: (0, j)),
        # pred BlockSpec((B_pad, TILE_V), lambda j: (0, j))), raise
        # vmem_limit_bytes (16 MiB default on v5e), size TILE_V for v7x's
        # 64 MiB VMEM (and consider fp8 W there), and replace the one-hot
        # embedding matmul with a scalar-prefetched row gather.
    )(*flat)


# ------------------------------------------------------------------
# Decoder forward with the PyTorch module's interface:
# pads batch once, runs the fused step, slices once.
# ------------------------------------------------------------------
def decoder_forward(prepped, input_ids, hidden, encoder_outputs=None):
    # isatt=False path: Attention.forward returns None and its result is unused.
    del encoder_outputs
    n_layers, B, H = hidden.shape
    B_pad = ((B + 7) // 8) * 8          # pad batch to f32 sublane multiple

    ids_pad = jnp.zeros((B_pad, 1), jnp.int32).at[:B, 0].set(
        input_ids.astype(jnp.int32))
    hid_pad = jnp.zeros((n_layers, B_pad, H), jnp.float32).at[:, :B, :].set(
        hidden.astype(jnp.float32))

    pred_pad, hnew_pad = decoder_step(prepped, ids_pad, hid_pad)
    return pred_pad[:B], hnew_pad[:, :B, :]


# ------------------------------------------------------------------
# Deterministic parameter construction (synthetic weights, PyTorch layout)
# ------------------------------------------------------------------
def make_params(key, cn_vocab_size, emb_dim, hid_dim, n_layers):
    H = hid_dim * 2          # decoder's GRU hidden size (self.hid_dim = hid_dim*2)
    keys = jax.random.split(key, 32)
    ki = iter(keys)

    def init(shape, scale=0.1):
        return jax.random.normal(next(ki), shape, dtype=jnp.float32) * scale

    params = {
        "embedding": init((cn_vocab_size, emb_dim)),
        "w_ih": [], "w_hh": [], "b_ih": [], "b_hh": [],
        # embedding2vocab1: H -> 2H, 2: 2H -> 4H, 3: 4H -> vocab
        "w1": init((H * 2, H)), "b1": init((H * 2,)),
        "w2": init((H * 4, H * 2)), "b2": init((H * 4,)),
        "w3": init((cn_vocab_size, H * 4)), "b3": init((cn_vocab_size,)),
    }
    for l in range(n_layers):
        d_in = emb_dim if l == 0 else H
        params["w_ih"].append(init((3 * H, d_in)))
        params["w_hh"].append(init((3 * H, H)))
        params["b_ih"].append(init((3 * H,)))
        params["b_hh"].append(init((3 * H,)))
    return params


# Pure-JAX f32 reference of the PyTorch forward, for correctness checking.
def reference_forward(params, input_ids, hidden):
    H = hidden.shape[-1]
    x = jnp.take(params["embedding"], input_ids, axis=0)
    new_h = []
    for l in range(hidden.shape[0]):
        h = hidden[l]
        gi = x @ params["w_ih"][l].T + params["b_ih"][l]
        gh = h @ params["w_hh"][l].T + params["b_hh"][l]
        r = jax.nn.sigmoid(gi[:, :H] + gh[:, :H])
        z = jax.nn.sigmoid(gi[:, H:2 * H] + gh[:, H:2 * H])
        n = jnp.tanh(gi[:, 2 * H:] + r * gh[:, 2 * H:])
        h_new = (1.0 - z) * n + z * h
        new_h.append(h_new)
        x = h_new
    new_h = jnp.stack(new_h, axis=0)
    o = x @ params["w1"].T + params["b1"]
    o = o @ params["w2"].T + params["b2"]
    pred = o @ params["w3"].T + params["b3"]
    return pred, new_h


if __name__ == "__main__":
    # small shapes consistent with the module
    cn_vocab_size = 128
    emb_dim = 32
    hid_dim = 16            # decoder GRU hidden = hid_dim*2 = 32
    n_layers = 2
    batch = 4
    enc_seq = 8

    key = jax.random.PRNGKey(0)
    k_par, k_in, k_hid, k_enc = jax.random.split(key, 4)

    params = make_params(k_par, cn_vocab_size, emb_dim, hid_dim, n_layers)
    prepped = prepare_params(params)          # one-time layout prep

    input_ids = jax.random.randint(k_in, (batch,), 0, cn_vocab_size,
                                   dtype=jnp.int32)                     # [B]
    hidden = jax.random.normal(k_hid, (n_layers, batch, hid_dim * 2),
                               dtype=jnp.float32)                       # [L,B,H]
    encoder_outputs = jax.random.normal(k_enc, (batch, enc_seq, hid_dim * 2),
                                        dtype=jnp.float32)              # unused

    fwd = jax.jit(decoder_forward)
    prediction, new_hidden = fwd(prepped, input_ids, hidden, encoder_outputs)
    jax.block_until_ready((prediction, new_hidden))

    assert prediction.shape == (batch, cn_vocab_size)
    assert new_hidden.shape == (n_layers, batch, hid_dim * 2)

    # correctness vs pure-JAX f32 reference of the PyTorch module
    # (tolerance loosened slightly because matmul weights are bf16 in-kernel)
    ref_pred, ref_hidden = reference_forward(params, input_ids, hidden)
    assert jnp.allclose(prediction, ref_pred, rtol=2e-2, atol=2e-2)
    assert jnp.allclose(new_hidden, ref_hidden, rtol=2e-2, atol=2e-2)

    print("KERNEL_OK")
</pallas_src>

<mosaic_0001>
module attributes {stable_mosaic.version = 11 : i64} {
  func.func @_decoder_step_kernel(%arg0: memref<8x1xi32, #tpu.memory_space<vmem>>, %arg1: memref<128x32xbf16, #tpu.memory_space<vmem>>, %arg2: memref<2x8x32xf32, #tpu.memory_space<vmem>>, %arg3: memref<32x96xbf16, #tpu.memory_space<vmem>>, %arg4: memref<32x96xbf16, #tpu.memory_space<vmem>>, %arg5: memref<32x96xbf16, #tpu.memory_space<vmem>>, %arg6: memref<32x96xbf16, #tpu.memory_space<vmem>>, %arg7: memref<2x1x128xf32, #tpu.memory_space<vmem>>, %arg8: memref<32x128xbf16, #tpu.memory_space<vmem>>, %arg9: memref<1x128xf32, #tpu.memory_space<vmem>>, %arg10: memref<8x128xf32, #tpu.memory_space<vmem>>, %arg11: memref<2x8x32xf32, #tpu.memory_space<vmem>>) attributes {dimension_semantics = [], scalar_prefetch = 0 : i64, scratch_operands = 0 : i64, tpu.core_type = #tpu.core_type<tc>} {
    %c0 = arith.constant 0 : index
    %c0_0 = arith.constant 0 : index
    %0 = vector.load %arg0[%c0, %c0_0] : memref<8x1xi32, #tpu.memory_space<vmem>>, vector<8x1xi32>
    %1 = tpu.iota {dimensions = array<i32: 1>} : vector<8x128xi32>
    %2 = vector.broadcast %0 : vector<8x1xi32> to vector<8x128xi32>
    %3 = arith.cmpi eq, %1, %2 : vector<8x128xi32>
    %4 = arith.extui %3 : vector<8x128xi1> to vector<8x128xi32>
    %5 = arith.sitofp %4 : vector<8x128xi32> to vector<8x128xf32>
    %6 = arith.truncf %5 : vector<8x128xf32> to vector<8x128xbf16>
    %c0_1 = arith.constant 0 : index
    %c0_2 = arith.constant 0 : index
    %7 = vector.load %arg1[%c0_1, %c0_2] : memref<128x32xbf16, #tpu.memory_space<vmem>>, vector<128x32xbf16>
    %cst = arith.constant dense<0.000000e+00> : vector<8x32xf32>
    %8 = tpu.matmul %6, %7, %cst {dimension_numbers = #tpu.dot_dimension_numbers<[1], [0], [0], [1], [0, 0, 1, 1], [], []>} : vector<8x128xbf16>, vector<128x32xbf16>, vector<8x32xf32> -> vector<8x32xf32>
    %c0_3 = arith.constant 0 : index
    %c0_4 = arith.constant 0 : index
    %c0_5 = arith.constant 0 : index
    %9 = vector.load %arg7[%c0_3, %c0_4, %c0_5] : memref<2x1x128xf32, #tpu.memory_space<vmem>>, vector<1x1x128xf32>
    %10 = vector.shape_cast %9 : vector<1x1x128xf32> to vector<1x128xf32>
    %11 = vector.extract_strided_slice %10 {offsets = [0, 0], sizes = [1, 96], strides = [1, 1]} : vector<1x128xf32> to vector<1x96xf32>
    %12 = vector.extract_strided_slice %10 {offsets = [0, 96], sizes = [1, 32], strides = [1, 1]} : vector<1x128xf32> to vector<1x32xf32>
    %c0_6 = arith.constant 0 : index
    %c0_7 = arith.constant 0 : index
    %c0_8 = arith.constant 0 : index
    %13 = vector.load %arg2[%c0_6, %c0_7, %c0_8] : memref<2x8x32xf32, #tpu.memory_space<vmem>>, vector<1x8x32xf32>
    %14 = vector.shape_cast %13 : vector<1x8x32xf32> to vector<8x32xf32>
    %15 = arith.truncf %8 : vector<8x32xf32> to vector<8x32xbf16>
    %c0_9 = arith.constant 0 : index
    %c0_10 = arith.constant 0 : index
    %16 = vector.load %arg3[%c0_9, %c0_10] : memref<32x96xbf16, #tpu.memory_space<vmem>>, vector<32x96xbf16>
    %cst_11 = arith.constant dense<0.000000e+00> : vector<8x96xf32>
    %17 = tpu.matmul %15, %16, %cst_11 {dimension_numbers = #tpu.dot_dimension_numbers<[1], [0], [0], [1], [0, 0, 1, 1], [], []>} : vector<8x32xbf16>, vector<32x96xbf16>, vector<8x96xf32> -> vector<8x96xf32>
    %18 = vector.broadcast %11 : vector<1x96xf32> to vector<8x96xf32>
    %19 = arith.addf %17, %18 : vector<8x96xf32>
    %20 = arith.truncf %14 : vector<8x32xf32> to vector<8x32xbf16>
    %c0_12 = arith.constant 0 : index
    %c0_13 = arith.constant 0 : index
    %21 = vector.load %arg4[%c0_12, %c0_13] : memref<32x96xbf16, #tpu.memory_space<vmem>>, vector<32x96xbf16>
    %cst_14 = arith.constant dense<0.000000e+00> : vector<8x96xf32>
    %22 = tpu.matmul %20, %21, %cst_14 {dimension_numbers = #tpu.dot_dimension_numbers<[1], [0], [0], [1], [0, 0, 1, 1], [], []>} : vector<8x32xbf16>, vector<32x96xbf16>, vector<8x96xf32> -> vector<8x96xf32>
    %23 = vector.extract_strided_slice %19 {offsets = [0, 0], sizes = [8, 64], strides = [1, 1]} : vector<8x96xf32> to vector<8x64xf32>
    %24 = vector.extract_strided_slice %22 {offsets = [0, 0], sizes = [8, 64], strides = [1, 1]} : vector<8x96xf32> to vector<8x64xf32>
    %25 = arith.addf %23, %24 : vector<8x64xf32>
    %26 = arith.negf %25 : vector<8x64xf32>
    %27 = math.exp %26 : vector<8x64xf32>
    %cst_15 = arith.constant 1.000000e+00 : f32
    %28 = vector.broadcast %cst_15 : f32 to vector<8x64xf32>
    %29 = arith.addf %28, %27 : vector<8x64xf32>
    %30 = arith.divf %28, %29 : vector<8x64xf32>
    %31 = vector.extract_strided_slice %30 {offsets = [0, 0], sizes = [8, 32], strides = [1, 1]} : vector<8x64xf32> to vector<8x32xf32>
    %32 = vector.extract_strided_slice %30 {offsets = [0, 32], sizes = [8, 32], strides = [1, 1]} : vector<8x64xf32> to vector<8x32xf32>
    %33 = vector.extract_strided_slice %19 {offsets = [0, 64], sizes = [8, 32], strides = [1, 1]} : vector<8x96xf32> to vector<8x32xf32>
    %34 = vector.extract_strided_slice %22 {offsets = [0, 64], sizes = [8, 32], strides = [1, 1]} : vector<8x96xf32> to vector<8x32xf32>
    %35 = vector.broadcast %12 : vector<1x32xf32> to vector<8x32xf32>
    %36 = arith.addf %34, %35 : vector<8x32xf32>
    %37 = arith.mulf %31, %36 : vector<8x32xf32>
    %38 = arith.addf %33, %37 : vector<8x32xf32>
    %39 = math.tanh %38 : vector<8x32xf32>
    %40 = arith.subf %14, %39 : vector<8x32xf32>
    %41 = arith.mulf %32, %40 : vector<8x32xf32>
    %42 = arith.addf %39, %41 : vector<8x32xf32>
    %c0_16 = arith.constant 0 : index
    %c0_17 = arith.constant 0 : index
    %c0_18 = arith.constant 0 : index
    %43 = vector.load %arg11[%c0_16, %c0_17, %c0_18] : memref<2x8x32xf32, #tpu.memory_space<vmem>>, vector<1x8x32xf32>
    %44 = vector.shape_cast %43 : vector<1x8x32xf32> to vector<8x32xf32>
    %45 = vector.shape_cast %42 : vector<8x32xf32> to vector<1x8x32xf32>
    tpu.vector_store %arg11[%c0_16, %c0_17, %c0_18], %45 {strides = array<i32>} : memref<2x8x32xf32, #tpu.memory_space<vmem>>, vector<1x8x32xf32>,
    %c1 = arith.constant 1 : index
    %c0_19 = arith.constant 0 : index
    %c0_20 = arith.constant 0 : index
    %46 = vector.load %arg7[%c1, %c0_19, %c0_20] : memref<2x1x128xf32, #tpu.memory_space<vmem>>, vector<1x1x128xf32>
    %47 = vector.shape_cast %46 : vector<1x1x128xf32> to vector<1x128xf32>
    %48 = vector.extract_strided_slice %47 {offsets = [0, 0], sizes = [1, 96], strides = [1, 1]} : vector<1x128xf32> to vector<1x96xf32>
    %49 = vector.extract_strided_slice %47 {offsets = [0, 96], sizes = [1, 32], strides = [1, 1]} : vector<1x128xf32> to vector<1x32xf32>
    %c1_21 = arith.constant 1 : index
    %c0_22 = arith.constant 0 : index
    %c0_23 = arith.constant 0 : index
    %50 = vector.load %arg2[%c1_21, %c0_22, %c0_23] : memref<2x8x32xf32, #tpu.memory_space<vmem>>, vector<1x8x32xf32>
    %51 = vector.shape_cast %50 : vector<1x8x32xf32> to vector<8x32xf32>
    %52 = arith.truncf %42 : vector<8x32xf32> to vector<8x32xbf16>
    %c0_24 = arith.constant 0 : index
    %c0_25 = arith.constant 0 : index
    %53 = vector.load %arg5[%c0_24, %c0_25] : memref<32x96xbf16, #tpu.memory_space<vmem>>, vector<32x96xbf16>
    %cst_26 = arith.constant dense<0.000000e+00> : vector<8x96xf32>
    %54 = tpu.matmul %52, %53, %cst_26 {dimension_numbers = #tpu.dot_dimension_numbers<[1], [0], [0], [1], [0, 0, 1, 1], [], []>} : vector<8x32xbf16>, vector<32x96xbf16>, vector<8x96xf32> -> vector<8x96xf32>
    %55 = vector.broadcast %48 : vector<1x96xf32> to vector<8x96xf32>
    %56 = arith.addf %54, %55 : vector<8x96xf32>
    %57 = arith.truncf %51 : vector<8x32xf32> to vector<8x32xbf16>
    %c0_27 = arith.constant 0 : index
    %c0_28 = arith.constant 0 : index
    %58 = vector.load %arg6[%c0_27, %c0_28] : memref<32x96xbf16, #tpu.memory_space<vmem>>, vector<32x96xbf16>
    %cst_29 = arith.constant dense<0.000000e+00> : vector<8x96xf32>
    %59 = tpu.matmul %57, %58, %cst_29 {dimension_numbers = #tpu.dot_dimension_numbers<[1], [0], [0], [1], [0, 0, 1, 1], [], []>} : vector<8x32xbf16>, vector<32x96xbf16>, vector<8x96xf32> -> vector<8x96xf32>
    %60 = vector.extract_strided_slice %56 {offsets = [0, 0], sizes = [8, 64], strides = [1, 1]} : vector<8x96xf32> to vector<8x64xf32>
    %61 = vector.extract_strided_slice %59 {offsets = [0, 0], sizes = [8, 64], strides = [1, 1]} : vector<8x96xf32> to vector<8x64xf32>
    %62 = arith.addf %60, %61 : vector<8x64xf32>
    %63 = arith.negf %62 : vector<8x64xf32>
    %64 = math.exp %63 : vector<8x64xf32>
    %cst_30 = arith.constant 1.000000e+00 : f32
    %65 = vector.broadcast %cst_30 : f32 to vector<8x64xf32>
    %66 = arith.addf %65, %64 : vector<8x64xf32>
    %67 = arith.divf %65, %66 : vector<8x64xf32>
    %68 = vector.extract_strided_slice %67 {offsets = [0, 0], sizes = [8, 32], strides = [1, 1]} : vector<8x64xf32> to vector<8x32xf32>
    %69 = vector.extract_strided_slice %67 {offsets = [0, 32], sizes = [8, 32], strides = [1, 1]} : vector<8x64xf32> to vector<8x32xf32>
    %70 = vector.extract_strided_slice %56 {offsets = [0, 64], sizes = [8, 32], strides = [1, 1]} : vector<8x96xf32> to vector<8x32xf32>
    %71 = vector.extract_strided_slice %59 {offsets = [0, 64], sizes = [8, 32], strides = [1, 1]} : vector<8x96xf32> to vector<8x32xf32>
    %72 = vector.broadcast %49 : vector<1x32xf32> to vector<8x32xf32>
    %73 = arith.addf %71, %72 : vector<8x32xf32>
    %74 = arith.mulf %68, %73 : vector<8x32xf32>
    %75 = arith.addf %70, %74 : vector<8x32xf32>
    %76 = math.tanh %75 : vector<8x32xf32>
    %77 = arith.subf %51, %76 : vector<8x32xf32>
    %78 = arith.mulf %69, %77 : vector<8x32xf32>
    %79 = arith.addf %76, %78 : vector<8x32xf32>
    %c1_31 = arith.constant 1 : index
    %c0_32 = arith.constant 0 : index
    %c0_33 = arith.constant 0 : index
    %80 = vector.load %arg11[%c1_31, %c0_32, %c0_33] : memref<2x8x32xf32, #tpu.memory_space<vmem>>, vector<1x8x32xf32>
    %81 = vector.shape_cast %80 : vector<1x8x32xf32> to vector<8x32xf32>
    %82 = vector.shape_cast %79 : vector<8x32xf32> to vector<1x8x32xf32>
    tpu.vector_store %arg11[%c1_31, %c0_32, %c0_33], %82 {strides = array<i32>} : memref<2x8x32xf32, #tpu.memory_space<vmem>>, vector<1x8x32xf32>,
    %83 = arith.truncf %79 : vector<8x32xf32> to vector<8x32xbf16>
    %c0_34 = arith.constant 0 : index
    %c0_35 = arith.constant 0 : index
    %84 = vector.load %arg8[%c0_34, %c0_35] : memref<32x128xbf16, #tpu.memory_space<vmem>>, vector<32x128xbf16>
    %cst_36 = arith.constant dense<0.000000e+00> : vector<8x128xf32>
    %85 = tpu.matmul %83, %84, %cst_36 {dimension_numbers = #tpu.dot_dimension_numbers<[1], [0], [0], [1], [0, 0, 1, 1], [], []>} : vector<8x32xbf16>, vector<32x128xbf16>, vector<8x128xf32> -> vector<8x128xf32>
    %c0_37 = arith.constant 0 : index
    %c0_38 = arith.constant 0 : index
    %86 = vector.load %arg9[%c0_37, %c0_38] : memref<1x128xf32, #tpu.memory_space<vmem>>, vector<1x128xf32>
    %87 = vector.broadcast %86 : vector<1x128xf32> to vector<8x128xf32>
    %88 = arith.addf %85, %87 : vector<8x128xf32>
    %c0_39 = arith.constant 0 : index
    %c0_40 = arith.constant 0 : index
    %89 = vector.load %arg10[%c0_39, %c0_40] : memref<8x128xf32, #tpu.memory_space<vmem>>, vector<8x128xf32>
    tpu.vector_store %arg10[%c0_39, %c0_40], %88 {strides = array<i32>} : memref<8x128xf32, #tpu.memory_space<vmem>>, vector<8x128xf32>,
    return
  }
}

</mosaic_0001>

<bundles_post_ra>
// kernel: decoder_forward.1
= control target key start
LH: loop header
LB: loop body
LE: loop exit
PB: predicated region body
PF: predicated region fallthrough
CT: control target
= control target key end

     0   :  { %v734_v0 = vmov 0   ;;  %v735_v2 = vmov 0.0   ;;  %vm736_vm0 = vmmov 0   ;;  %v39_v13 = vlaneseq  ;;  %s740_s25 = smov 32   ;;  %s935_s0 = inlined_call_operand.vmem [shape: s32[8,1], index: 0, kind: input, shape index: {}]   ;;  %s936_s1 = inlined_call_operand.vmem [shape: bf16[128,32], index: 1, kind: input, shape index: {}]   ;;  %s937_s3 = inlined_call_operand.vmem [shape: bf16[32,96], index: 3, kind: input, shape index: {}]   ;;  %s938_s4 = inlined_call_operand.vmem [shape: bf16[32,96], index: 4, kind: input, shape index: {}]   ;;  %s939_s7 = inlined_call_operand.vmem [shape: f32[2,1,128], index: 7, kind: input, shape index: {}]   ;;  %s940_s2 = inlined_call_operand.vmem [shape: f32[2,8,32], index: 2, kind: input, shape index: {}, may-alias: {2,11}]   ;;  %s941_s5 = inlined_call_operand.vmem [shape: bf16[32,96], index: 5, kind: input, shape index: {}]   ;;  %s942_s6 = inlined_call_operand.vmem [shape: bf16[32,96], index: 6, kind: input, shape index: {}]   ;;  %s943_s8 = inlined_call_operand.vmem [shape: bf16[32,128], index: 8, kind: input, shape index: {}]   ;;  %s944_s11 = inlined_call_operand.vmem [shape: f32[2,8,32], index: 11, kind: output, shape index: {1}, may-alias: {2,11}]   ;;  %s945_s9 = inlined_call_operand.vmem [shape: f32[1,128], index: 9, kind: input, shape index: {}]   ;;  %s946_s10 = inlined_call_operand.vmem [shape: f32[8,128], index: 10, kind: output, shape index: {0}]  }
   0x1   :  { %703 = vset.pattern.permute.xlu0 %v734_v0  ;;  %v38_v1 = vld [vmem:[%s935_s0] sm:$0xff]  ;;  %636 = vmatprep.subr.bf16.mxu0 %v735_v2  ;;  %v705_v4 = vld [vmem:[%s936_s1 + $0x8] sm:$0xff]   ;;  %v706_v5 = vld [vmem:[%s936_s1 + $0x10] sm:$0xff]   ;;  %v737_v16 = vmov 1.0|1.0   ;;  %vm177_vm3 = vcmask 261120  }
   0x2   :  { %42 = vperm.xlu0 %703, %v38_v1   ;;  %v704_v3 = vld [vmem:[%s936_s1] sm:$0xff]   ;;  %656 = vmatprep.subr.bf16.mxu1 %v735_v2  ;;  %v713_v7 = vld [vmem:[%s937_s3 + $0x8] sm:$0xff]   ;;  %v707_v8 = vld [vmem:[%s936_s1 + $0x18] sm:$0xff]   ;;  %v40_v14 = vand.u32 127, %v39_v13 }
   0x3   :  { %637 = vmatpush3.bf16.msra.mxu0 %v704_v3  ;;  %652 = vmatprep.mubr.msk.bf16.mxu0 %vm736_vm0, %v735_v2  ;;  %v712_v6 = vld [vmem:[%s937_s3] sm:$0xff]   ;;  %v709_v10 = vld [vmem:[%s936_s1 + $0x28] sm:$0xff]   ;;  %v710_v11 = vld [vmem:[%s936_s1 + $0x30] sm:$0xff]  }
   0x4   :  { %638 = vmatprep.subr.bf16.mxu0 %v735_v2  ;;  %660 = vmatprep.mubr.msk.bf16.mxu1 %vm736_vm0, %v735_v2  ;;  %v708_v9 = vld [vmem:[%s936_s1 + $0x20] sm:$0xff]   ;;  %v711_v12 = vld [vmem:[%s936_s1 + $0x38] sm:$0xff]   ;;  %s738_s1 = smov 96   ;;  %v715_v24 = vld [vmem:[%s938_s4 + $0x8] sm:$0xff]  }
   0x5   :  { %657 = vmatpush3.bf16.msra.mxu1 %v712_v6  ;;  %v589_v17 = vld [vmem:[%s939_s7] ss:$0 sm:$0xff]  ;;  %v717_v51 = vld [vmem:[%s941_s5 + $0x8] sm:$0xff]   ;;  %v599_v55 = vld [vmem:[%s939_s7 + $0x1] ss:$0 sm:$0xff] }
   0x6   :  { %658 = vmatprep.subr.bf16.mxu1 %v735_v2  ;;  %288 = vrot.lane.b32.xlu0 %v589_v17, %s738_s1  ;;  %v714_v19 = vld [vmem:[%s938_s4] sm:$0xff]   ;;  %s739_s4 = smov 64   ;;  %v719_v60 = vld [vmem:[%s942_s6 + $0x8] sm:$0xff]  }
   0x7   :  { %639 = vmatpush3.bf16.msra.mxu0 %v705_v4  ;;  %v153_v25 = vld [vmem:[%s940_s2] sm:$0xff]  ;;  %v598_v61 = vld [vmem:[%s940_s2 + $0x8] sm:$0xff] }
   0x8   :  { %640 = vmatprep.subr.bf16.mxu0 %v735_v2  ;;  %v221_v26 = vpack.c.bf16 %v153_v25, %v153_v25  ;;  %v716_v50 = vld [vmem:[%s941_s5] sm:$0xff]   ;;  %v396_v62 = vpack.c.bf16 %v598_v61, %v598_v61 }
   0x9   :  { %659 = vmatpush3.bf16.msra.mxu1 %v713_v7  ;;  %v718_v58 = vld [vmem:[%s942_s6] sm:$0xff]  }
   0xa   :  { %664 = vmatprep.subr.bf16.mxu1 %v735_v2 }
   0xb   :  { %641 = vmatpush3.bf16.msra.mxu0 %v706_v5 }
   0xc   :  { %642 = vmatprep.subr.bf16.mxu0 %v735_v2 }
   0xf   :  { %643 = vmatpush3.bf16.msra.mxu0 %v707_v8 }
  0x10   :  { %644 = vmatprep.subr.bf16.mxu0 %v735_v2 }
  0x13   :  { %645 = vmatpush3.bf16.msra.mxu0 %v708_v9 }
  0x14   :  { %646 = vmatprep.subr.bf16.mxu0 %v735_v2 }
  0x17   :  { %647 = vmatpush3.bf16.msra.mxu0 %v709_v10 }
  0x18   :  { %648 = vmatprep.subr.bf16.mxu0 %v735_v2 }
  0x1b   :  { %649 = vmatpush3.bf16.msra.mxu0 %v710_v11 }
  0x1c   :  { %650 = vmatprep.subr.bf16.mxu0 %v735_v2 }
  0x1f   :  { %651 = vmatpush3.bf16.msra.mxu0 %v711_v12 }
  0x20   :  { %688 = vmatprep.subr.bf16.mxu0 %v735_v2 }
  0x81   :  { %v43_v15 = vpop.permute.xlu0 %42 }
  0x82   :  { %vm44_vm1 = vcmp.eq.s32.totalorder %v40_v14, %v43_v15 }
  0x83   :  { %vm587_vm2 = vmpackc.low %vm44_vm1, %vm44_vm1 }
  0x84   :  { %653 = vmatmul.mubr.msk.bf16.vlgmr.msra.gmra.mrb[0].mxu0 %vm587_vm2, %v737_v16 }
  0x85   :  { %692 = vmatprep.mubr.msk.bf16.mxu0 %vm736_vm0, %v735_v2  ;;  %v289_v31 = vpop.permute.xlu0 %288 }
 0x157   :  { %v146_v18 = vpop.f32.mrb[0].mxu0 }
 0x158   :  { %v154_v20 = vpack.c.bf16 %v146_v18, %v146_v18  ;;  %v654_v21 = vpop.f32.mrb[1].mxu0 }
 0x159   :  { %v149_v22 = vpop.f32.mrb[2].mxu0 }
 0x15a   :  { %v655_v23 = vpop.f32.mrb[3].mxu0  ;;  %661 = vmatmul.mubr.msk.bf16.vlgmr.msra.gmra.mrb[0].mxu1 %vm177_vm3, %v154_v20 }
 0x15b   :  { %665 = vmatpush3.bf16.msra.mxu1 %v714_v19  ;;  %668 = vmatprep.mubr.msk.bf16.mxu1 %vm736_vm0, %v735_v2  ;;  %v720_v23 = vld [vmem:[%s943_s8] sm:$0xff]  }
 0x15c   :  { %666 = vmatprep.subr.bf16.mxu1 %v735_v2  ;;  %689 = vmatpush3.bf16.msra.mxu0 %v720_v23 }
 0x15d   :  { %690 = vmatprep.subr.bf16.mxu0 %v735_v2 }
 0x15f   :  { %667 = vmatpush3.bf16.msra.mxu1 %v715_v24 }
 0x160   :  { %672 = vmatprep.subr.bf16.mxu1 %v735_v2 }
 0x162   :  { %669 = vmatmul.mubr.msk.bf16.vlgmr.msra.gmra.mrb[4].mxu1 %vm177_vm3, %v221_v26  ;;  %v721_v26 = vld [vmem:[%s943_s8 + $0x8] sm:$0xff]  }
 0x163   :  { %676 = vmatprep.mubr.msk.bf16.mxu1 %vm736_vm0, %v735_v2  ;;  %673 = vmatpush3.bf16.msra.mxu1 %v716_v50 }
 0x164   :  { %674 = vmatprep.subr.bf16.mxu1 %v735_v2  ;;  %691 = vmatpush3.bf16.msra.mxu0 %v721_v26 }
 0x167   :  { %675 = vmatpush3.bf16.msra.mxu1 %v717_v51 }
 0x168   :  { %680 = vmatprep.subr.bf16.mxu1 %v735_v2 }
 0x22d   :  { %v215_v27 = vpop.f32.mrb[0].mxu1 }
 0x22e   :  { %v662_v28 = vpop.f32.mrb[1].mxu1  ;;  %v216_v37 = vadd.f32 %v589_v17, %v215_v27 }
 0x22f   :  { %v218_v29 = vpop.f32.mrb[2].mxu1 }
 0x230   :  { %v663_v30 = vpop.f32.mrb[3].mxu1 }
 0x235   :  { %v275_v32 = vpop.f32.mrb[4].mxu1 }
 0x236   :  { %v291_v33 = vadd.f32 %v289_v31, %v275_v32  ;;  %v670_v34 = vpop.f32.mrb[5].mxu1  ;;  %v281_v38 = vadd.f32 %v275_v32, %v216_v37  ;;  %v608_v32 = vld [vmem:[%s945_s9] ss:$0 sm:$0xff] }
 0x237   :  { %v278_v35 = vpop.f32.mrb[6].mxu1 }
 0x238   :  { %v671_v36 = vpop.f32.mrb[7].mxu1  ;;  %293 = vrot.lane.b32.xlu1 %v291_v33, %s739_s4  ;;  %v596_v39 = vmul.f32 -1.442695, %v281_v38 }
 0x23a   :  { %722 = vpow2.f32 %v596_v39 }
 0x244   :  { %v723_v40 = vpop.eup %722 }
 0x245   :  { %v285_v41 = vadd.f32 1.0, %v723_v40 }
 0x247   :  { %724 = vrcp.f32 %v285_v41 }
 0x251   :  { %v725_v42 = vpop.eup %724 }
 0x2aa   :  { %v294_v43 = vpop.permute.xlu1 %293 }
 0x2ab   :  { %v296_v44 = vmul.f32 %v725_v42, %v294_v43 }
 0x2ad   :  { %298 = vrot.lane.b32.xlu1 %v296_v44, %s739_s4 }
 0x31f   :  { %v299_v45 = vpop.permute.xlu1 %298 }
 0x320   :  { %v301_v46 = vadd.f32 %v299_v45, %v216_v37 }
 0x322   :  { %726 = vtanh.f32 %v301_v46 }
 0x32c   :  { %v727_v47 = vpop.eup %726 }
 0x32d   :  { %304 = vrot.lane.b32.xlu0 %v727_v47, %s739_s4 }
 0x39f   :  { %v305_v48 = vpop.permute.xlu0 %304 }
 0x3a0   :  { %v307_v49 = vsub.f32 %v153_v25, %v305_v48 }
 0x3a2   :  { %309 = vrot.lane.b32.xlu1 %v307_v49, %s740_s25 }
 0x414   :  { %v310_v52 = vpop.permute.xlu1 %309 }
 0x415   :  { %v312_v53 = vmul.f32 %v725_v42, %v310_v52 }
 0x417   :  { %314 = vrot.lane.b32.xlu0 %v312_v53, %s740_s25 }
 0x41b   :  { %463 = vrot.lane.b32.xlu0 %v599_v55, %s738_s1 }
 0x489   :  { %v315_v54 = vpop.permute.xlu0 %314 }
 0x48a   :  { %v317_v56 = vadd.f32 %v727_v47, %v315_v54 }
 0x48c   :  { %v327_v57 = vpack.c.bf16 %v317_v56, %v317_v56 }
 0x48d   :  { %v464_v4 = vpop.permute.xlu0 %463 }
 0x48e   :  { %339 = vrot.lane.b32.xlu1 %v327_v57, %s739_s4 }
 0x500   :  { %v340_v59 = vpop.permute.xlu1 %339 }
 0x501   :  { %677 = vmatmul.mubr.msk.bf16.vlgmr.msra.gmra.mrb[8].mxu1 %vm177_vm3, %v340_v59 }
 0x502   :  { %681 = vmatpush3.bf16.msra.mxu1 %v718_v58  ;;  %684 = vmatprep.mubr.msk.bf16.mxu1 %vm736_vm0, %v735_v2 }
 0x503   :  { %682 = vmatprep.subr.bf16.mxu1 %v735_v2 }
 0x506   :  { %683 = vmatpush3.bf16.msra.mxu1 %v719_v60 }
 0x509   :  { %685 = vmatmul.mubr.msk.bf16.vlgmr.msra.gmra.mrb[12].mxu1 %vm177_vm3, %v396_v62 }
 0x5d4   :  { %v390_v63 = vpop.f32.mrb[8].mxu1 }
 0x5d5   :  { %v678_v0 = vpop.f32.mrb[9].mxu1  ;;  %v391_v10 = vadd.f32 %v599_v55, %v390_v63 }
 0x5d6   :  { %v393_v1 = vpop.f32.mrb[10].mxu1 }
 0x5d7   :  { %v679_v3 = vpop.f32.mrb[11].mxu1 }
 0x5dc   :  { %v450_v5 = vpop.f32.mrb[12].mxu1 }
 0x5dd   :  { %v466_v6 = vadd.f32 %v464_v4, %v450_v5  ;;  %v686_v7 = vpop.f32.mrb[13].mxu1  ;;  %v456_v11 = vadd.f32 %v450_v5, %v391_v10 }
 0x5de   :  { %v453_v8 = vpop.f32.mrb[14].mxu1 }
 0x5df   :  { %v687_v9 = vpop.f32.mrb[15].mxu1  ;;  %468 = vrot.lane.b32.xlu1 %v466_v6, %s739_s4  ;;  %v606_v12 = vmul.f32 -1.442695, %v456_v11 }
 0x5e1   :  { %728 = vpow2.f32 %v606_v12 }
 0x5eb   :  { %v729_v13 = vpop.eup %728 }
 0x5ec   :  { %v460_v14 = vadd.f32 1.0, %v729_v13 }
 0x5ee   :  { %730 = vrcp.f32 %v460_v14 }
 0x5f8   :  { %v731_v15 = vpop.eup %730 }
 0x651   :  { %v469_v16 = vpop.permute.xlu1 %468 }
 0x652   :  { %v471_v17 = vmul.f32 %v731_v15, %v469_v16 }
 0x654   :  { %473 = vrot.lane.b32.xlu0 %v471_v17, %s739_s4 }
 0x6c6   :  { %v474_v18 = vpop.permute.xlu0 %473 }
 0x6c7   :  { %v476_v19 = vadd.f32 %v474_v18, %v391_v10 }
 0x6c9   :  { %732 = vtanh.f32 %v476_v19 }
 0x6d3   :  { %v733_v20 = vpop.eup %732 }
 0x6d4   :  { %479 = vrot.lane.b32.xlu1 %v733_v20, %s739_s4 }
 0x746   :  { %v480_v21 = vpop.permute.xlu1 %479 }
 0x747   :  { %v482_v22 = vsub.f32 %v598_v61, %v480_v21 }
 0x749   :  { %484 = vrot.lane.b32.xlu0 %v482_v22, %s740_s25 }
 0x7bb   :  { %v485_v24 = vpop.permute.xlu0 %484 }
 0x7bc   :  { %v487_v25 = vmul.f32 %v731_v15, %v485_v24 }
 0x7be   :  { %489 = vrot.lane.b32.xlu1 %v487_v25, %s740_s25 }
 0x7c2   :  { %319 = vrot.lane.b32.xlu1 %v317_v56, %s739_s4 }
 0x830   :  { %v490_v27 = vpop.permute.xlu1 %489 }
 0x831   :  { %v492_v28 = vadd.f32 %v733_v20, %v490_v27 }
 0x833   :  { %v499_v29 = vpack.c.bf16 %v492_v28, %v492_v28 }
 0x834   :  { %v320_v30 = vpop.permute.xlu1 %319 }
 0x835   :  { %322 = vst.msk [vmem:[%s944_s11] sm:$0xff] %vm177_vm3, %v320_v30  ;;  %512 = vrot.lane.b32.xlu0 %v499_v29, %s739_s4 }
 0x839   :  { %494 = vrot.lane.b32.xlu0 %v492_v28, %s739_s4 }
 0x8a7   :  { %v513_v31 = vpop.permute.xlu0 %512 }
 0x8a8   :  { %693 = vmatmul.mubr.msk.bf16.vlgmr.msra.gmra.mrb[4].mxu0 %vm177_vm3, %v513_v31 }
 0x8ab   :  { %v495_v2 = vpop.permute.xlu0 %494 }
 0x8ac   :  { %607 = vst.msk [vmem:[%s944_s11 + $0x8] sm:$0xff] %vm177_vm3, %v495_v2 }
 0x97b   :  { %v563_v33 = vpop.f32.mrb[4].mxu0 }
 0x97c   :  { %v564_v34 = vadd.f32 %v608_v32, %v563_v33  ;;  %v694_v35 = vpop.f32.mrb[5].mxu0 }
 0x97d   :  { %v566_v36 = vpop.f32.mrb[6].mxu0 }
 0x97e   :  { %569 = vst [vmem:[%s946_s10] sm:$0xff] %v564_v34  ;;  %v695_v37 = vpop.f32.mrb[7].mxu0 }

</bundles_post_ra>
